<compile_context>
chip_gen: v5e
topology: v5e:2x2
jax: 0.10.0
libtpu: 0.0.40
codegen_flags: <defaults>
</compile_context>

<pallas_src>
import jax
import jax.numpy as jnp
from jax.experimental import pallas as pl
from jax.experimental.pallas import tpu as pltpu


def _final_layer_kernel(x_ref, shift_ref, scale_ref, w_ref, b_ref, o_ref):
    """One grid step == (one batch element, one S tile).

    x_ref:     (1, TS, D)       activation tile (f32)
    shift_ref: (1, 1, D)        per-batch adaLN shift (f32, precomputed outside)
    scale_ref: (1, 1, D)        per-batch adaLN scale (f32, precomputed outside)
    w_ref:     (D, OUT_PAD)     final projection weight (bf16, lane-dense padded)
    b_ref:     (1, OUT_PAD)     final projection bias   (f32,  lane-dense padded)
    o_ref:     (1, TS, OUT_PAD) output tile
    """
    x = x_ref[0]                     # (TS, D)
    shift = shift_ref[0]             # (1, D)
    scale = scale_ref[0]             # (1, D)

    # Single-pass LayerNorm statistics (no affine, eps=1e-6), kept in f32.
    inv_d = 1.0 / x.shape[-1]
    mean = jnp.sum(x, axis=-1, keepdims=True) * inv_d
    mean_sq = jnp.sum(x * x, axis=-1, keepdims=True) * inv_d
    var = mean_sq - mean * mean
    xn = (x - mean) * jax.lax.rsqrt(var + 1e-6)

    # adaLN modulation: x * (1 + scale) + shift  (broadcast over the S tile).
    xm = xn * (1.0 + scale) + shift

    # Final projection on the MXU; bf16 operands, f32 accumulation.
    out = jnp.dot(xm.astype(w_ref.dtype), w_ref[...],
                  preferred_element_type=jnp.float32)
    out = out + b_ref[...]
    o_ref[0] = out.astype(o_ref.dtype)


def final_layer(x, cond, w_ada, b_ada, w_lin, b_lin, *,
                seq_tile=512, matmul_dtype=jnp.bfloat16):
    """FinalLayer forward.

    x: (B, S, D) f32, cond: (B, C, D) f32.
    w_ada: (D, 2D), b_ada: (1, 2D), w_lin: (D, out_dim), b_lin: (1, out_dim)
    (weights pre-transposed to in-major layout).

    NOTE: on v7x keep seq_tile around 512 (64 MiB VMEM/TC); on v5e/v6e it can
    be raised (e.g. 1024) at production D.
    """
    B, S, D = x.shape
    out_dim = w_lin.shape[1]

    # ---- adaLN branch hoisted out of the kernel (batched XLA matmul) ----
    c = jnp.sum(cond, axis=1, keepdims=True)                  # (B, 1, D)
    s = c * jax.nn.sigmoid(c)                                 # SiLU
    ada = jnp.einsum('bod,de->boe', s, w_ada) + b_ada          # (B, 1, 2D)
    shift = ada[..., :D].astype(jnp.float32)                   # (B, 1, D)
    scale = ada[..., D:].astype(jnp.float32)                   # (B, 1, D)

    # ---- lane-dense output padding (avoid masked vst.msk partial stores) ----
    out_pad = -(-out_dim // 128) * 128
    if out_pad != out_dim:
        w_p = jnp.pad(w_lin, ((0, 0), (0, out_pad - out_dim)))
        b_p = jnp.pad(b_lin, ((0, 0), (0, out_pad - out_dim)))
    else:
        w_p, b_p = w_lin, b_lin
    w_p = w_p.astype(matmul_dtype)     # halve weight DMA traffic, bf16 MXU
    b_p = b_p.astype(jnp.float32)      # bias added after f32 accumulation

    # ---- sequence tiling ----
    ts = S if S <= seq_tile else seq_tile
    n_s = pl.cdiv(S, ts)

    # ---- VMEM budget derived from the chosen tiles (+ headroom) ----
    x_bytes = jnp.dtype(x.dtype).itemsize
    w_bytes = jnp.dtype(matmul_dtype).itemsize
    needed = (2 * ts * D * x_bytes            # x tile, double buffered
              + 2 * ts * out_pad * 4          # out tile, double buffered
              + 2 * D * out_pad * w_bytes     # resident projection weight
              + 4 * D * 4                     # shift/scale buffers
              + 2 * out_pad * 4)              # bias
    vmem_limit = int(min(112 << 20, max(needed + (8 << 20), 32 << 20)))

    cost = pl.CostEstimate(
        flops=2 * B * S * D * out_pad,
        transcendentals=0,
        bytes_accessed=(B * S * D * x_bytes
                        + B * S * out_pad * 4
                        + D * out_pad * w_bytes
                        + 2 * B * D * 4))

    out_padded = pl.pallas_call(
        _final_layer_kernel,
        out_shape=jax.ShapeDtypeStruct((B, S, out_pad), x.dtype),
        grid_spec=pltpu.PrefetchScalarGridSpec(
            num_scalar_prefetch=0,
            grid=(B, n_s),
            in_specs=[
                pl.BlockSpec((1, ts, D), lambda b, t: (b, t, 0)),
                pl.BlockSpec((1, 1, D), lambda b, t: (b, 0, 0)),
                pl.BlockSpec((1, 1, D), lambda b, t: (b, 0, 0)),
                pl.BlockSpec((D, out_pad), lambda b, t: (0, 0)),
                pl.BlockSpec((1, out_pad), lambda b, t: (0, 0)),
            ],
            out_specs=pl.BlockSpec((1, ts, out_pad), lambda b, t: (b, t, 0)),
        ),
        compiler_params=pltpu.CompilerParams(
            dimension_semantics=("parallel", "parallel"),
            vmem_limit_bytes=vmem_limit),
        cost_estimate=cost,
    )(x, shift, scale, w_p, b_p)

    if out_pad != out_dim:
        return out_padded[..., :out_dim]
    return out_padded


def reference(x, cond, w_ada, b_ada, w_lin, b_lin):
    """Pure-JAX f32 reference matching the PyTorch module."""
    c = jnp.sum(cond, axis=1, keepdims=True)
    s = c * jax.nn.sigmoid(c)
    ada = s @ w_ada + b_ada
    D = x.shape[-1]
    shift, scale = ada[..., :D], ada[..., D:]
    mean = jnp.mean(x, axis=-1, keepdims=True)
    var = jnp.mean((x - mean) ** 2, axis=-1, keepdims=True)
    xn = (x - mean) * jax.lax.rsqrt(var + 1e-6)
    xm = xn * (1.0 + scale) + shift
    return xm @ w_lin + b_lin


if __name__ == "__main__":
    B, S, C, D, OUT = 2, 8, 4, 32, 16
    key = jax.random.PRNGKey(0)
    kx, kc, k1, k2, k3, k4 = jax.random.split(key, 6)

    x = jax.random.normal(kx, (B, S, D), jnp.float32)
    cond = jax.random.normal(kc, (B, C, D), jnp.float32)

    # PyTorch Linear weights are (out, in); stored pre-transposed as (in, out).
    w_ada = jax.random.normal(k1, (D, 2 * D), jnp.float32) * 0.05
    b_ada = jax.random.normal(k2, (1, 2 * D), jnp.float32) * 0.05
    w_lin = jax.random.normal(k3, (D, OUT), jnp.float32) * 0.05
    b_lin = jax.random.normal(k4, (1, OUT), jnp.float32) * 0.05

    out = final_layer(x, cond, w_ada, b_ada, w_lin, b_lin)
    out = jax.block_until_ready(out)

    ref = reference(x, cond, w_ada, b_ada, w_lin, b_lin)
    assert out.shape == (B, S, OUT)
    # Final matmul runs in bf16 (f32 accumulation) -> relaxed tolerance vs
    # the all-f32 reference.
    assert jnp.allclose(out, ref, atol=2e-2, rtol=2e-2), (
        float(jnp.max(jnp.abs(out - ref))))
    print("KERNEL_OK")
</pallas_src>

<mosaic_0001>
module attributes {stable_mosaic.version = 11 : i64} {
  func.func @_final_layer_kernel(%arg0: i32, %arg1: i32, %arg2: memref<1x8x32xf32, #tpu.memory_space<vmem>>, %arg3: memref<1x1x32xf32, #tpu.memory_space<vmem>>, %arg4: memref<1x1x32xf32, #tpu.memory_space<vmem>>, %arg5: memref<32x128xbf16, #tpu.memory_space<vmem>>, %arg6: memref<1x128xf32, #tpu.memory_space<vmem>>, %arg7: memref<1x8x128xf32, #tpu.memory_space<vmem>>) attributes {dimension_semantics = [#tpu.dimension_semantics<parallel>, #tpu.dimension_semantics<parallel>], iteration_bounds = array<i64: 2, 1>, scalar_prefetch = 0 : i64, scratch_operands = 0 : i64, tpu.core_type = #tpu.core_type<tc>, window_params = [{transform_indices = @transform_0, window_bounds = array<i64: 1, 8, 32>}, {transform_indices = @transform_1, window_bounds = array<i64: 1, 1, 32>}, {transform_indices = @transform_2, window_bounds = array<i64: 1, 1, 32>}, {pipeline_mode = #tpu.pipeline_mode<synchronous>, transform_indices = @transform_3, window_bounds = array<i64: 32, 128>}, {pipeline_mode = #tpu.pipeline_mode<synchronous>, transform_indices = @transform_4, window_bounds = array<i64: 1, 128>}, {transform_indices = @transform_5, window_bounds = array<i64: 1, 8, 128>}]} {
    %c0 = arith.constant 0 : index
    %c0_0 = arith.constant 0 : index
    %c0_1 = arith.constant 0 : index
    %0 = vector.load %arg2[%c0, %c0_0, %c0_1] : memref<1x8x32xf32, #tpu.memory_space<vmem>>, vector<1x8x32xf32>
    %1 = vector.shape_cast %0 : vector<1x8x32xf32> to vector<8x32xf32>
    %c0_2 = arith.constant 0 : index
    %c0_3 = arith.constant 0 : index
    %c0_4 = arith.constant 0 : index
    %2 = vector.load %arg3[%c0_2, %c0_3, %c0_4] : memref<1x1x32xf32, #tpu.memory_space<vmem>>, vector<1x1x32xf32>
    %3 = vector.shape_cast %2 : vector<1x1x32xf32> to vector<1x32xf32>
    %c0_5 = arith.constant 0 : index
    %c0_6 = arith.constant 0 : index
    %c0_7 = arith.constant 0 : index
    %4 = vector.load %arg4[%c0_5, %c0_6, %c0_7] : memref<1x1x32xf32, #tpu.memory_space<vmem>>, vector<1x1x32xf32>
    %5 = vector.shape_cast %4 : vector<1x1x32xf32> to vector<1x32xf32>
    %cst = arith.constant dense<0.000000e+00> : vector<8xf32>
    %6 = vector.multi_reduction <add>, %1, %cst [1] : vector<8x32xf32> to vector<8xf32>
    %7 = vector.shape_cast %6 : vector<8xf32> to vector<8x1xf32>
    %cst_8 = arith.constant 3.125000e-02 : f32
    %8 = vector.broadcast %cst_8 : f32 to vector<8x1xf32>
    %9 = arith.mulf %7, %8 : vector<8x1xf32>
    %10 = arith.mulf %1, %1 : vector<8x32xf32>
    %cst_9 = arith.constant dense<0.000000e+00> : vector<8xf32>
    %11 = vector.multi_reduction <add>, %10, %cst_9 [1] : vector<8x32xf32> to vector<8xf32>
    %12 = vector.shape_cast %11 : vector<8xf32> to vector<8x1xf32>
    %cst_10 = arith.constant 3.125000e-02 : f32
    %13 = vector.broadcast %cst_10 : f32 to vector<8x1xf32>
    %14 = arith.mulf %12, %13 : vector<8x1xf32>
    %15 = arith.mulf %9, %9 : vector<8x1xf32>
    %16 = arith.subf %14, %15 : vector<8x1xf32>
    %17 = vector.broadcast %9 : vector<8x1xf32> to vector<8x32xf32>
    %18 = arith.subf %1, %17 : vector<8x32xf32>
    %cst_11 = arith.constant 9.99999997E-7 : f32
    %19 = vector.broadcast %cst_11 : f32 to vector<8x1xf32>
    %20 = arith.addf %16, %19 : vector<8x1xf32>
    %21 = math.rsqrt %20 : vector<8x1xf32>
    %22 = vector.broadcast %21 : vector<8x1xf32> to vector<8x32xf32>
    %23 = arith.mulf %18, %22 : vector<8x32xf32>
    %cst_12 = arith.constant 1.000000e+00 : f32
    %24 = vector.broadcast %cst_12 : f32 to vector<1x32xf32>
    %25 = arith.addf %24, %5 : vector<1x32xf32>
    %26 = vector.broadcast %25 : vector<1x32xf32> to vector<8x32xf32>
    %27 = arith.mulf %23, %26 : vector<8x32xf32>
    %28 = vector.broadcast %3 : vector<1x32xf32> to vector<8x32xf32>
    %29 = arith.addf %27, %28 : vector<8x32xf32>
    %30 = arith.truncf %29 : vector<8x32xf32> to vector<8x32xbf16>
    %c0_13 = arith.constant 0 : index
    %c0_14 = arith.constant 0 : index
    %31 = vector.load %arg5[%c0_13, %c0_14] : memref<32x128xbf16, #tpu.memory_space<vmem>>, vector<32x128xbf16>
    %cst_15 = arith.constant dense<0.000000e+00> : vector<8x128xf32>
    %32 = tpu.matmul %30, %31, %cst_15 {dimension_numbers = #tpu.dot_dimension_numbers<[1], [0], [0], [1], [0, 0, 1, 1], [], []>} : vector<8x32xbf16>, vector<32x128xbf16>, vector<8x128xf32> -> vector<8x128xf32>
    %c0_16 = arith.constant 0 : index
    %c0_17 = arith.constant 0 : index
    %33 = vector.load %arg6[%c0_16, %c0_17] : memref<1x128xf32, #tpu.memory_space<vmem>>, vector<1x128xf32>
    %34 = vector.broadcast %33 : vector<1x128xf32> to vector<8x128xf32>
    %35 = arith.addf %32, %34 : vector<8x128xf32>
    %c0_18 = arith.constant 0 : index
    %c0_19 = arith.constant 0 : index
    %c0_20 = arith.constant 0 : index
    %36 = vector.load %arg7[%c0_18, %c0_19, %c0_20] : memref<1x8x128xf32, #tpu.memory_space<vmem>>, vector<1x8x128xf32>
    %37 = vector.shape_cast %36 : vector<1x8x128xf32> to vector<8x128xf32>
    %38 = vector.shape_cast %35 : vector<8x128xf32> to vector<1x8x128xf32>
    tpu.vector_store %arg7[%c0_18, %c0_19, %c0_20], %38 {strides = array<i32>} : memref<1x8x128xf32, #tpu.memory_space<vmem>>, vector<1x8x128xf32>,
    return
  }
  func.func @transform_0(%arg0: i32, %arg1: i32) -> (i32, i32, i32) {
    %c0_i32 = arith.constant 0 : i32
    %c0_i32_0 = arith.constant 0 : i32
    return %arg0, %arg1, %c0_i32 : i32, i32, i32
  }
  func.func @transform_1(%arg0: i32, %arg1: i32) -> (i32, i32, i32) {
    %c0_i32 = arith.constant 0 : i32
    %c0_i32_0 = arith.constant 0 : i32
    %c0_i32_1 = arith.constant 0 : i32
    return %arg0, %c0_i32, %c0_i32_0 : i32, i32, i32
  }
  func.func @transform_2(%arg0: i32, %arg1: i32) -> (i32, i32, i32) {
    %c0_i32 = arith.constant 0 : i32
    %c0_i32_0 = arith.constant 0 : i32
    %c0_i32_1 = arith.constant 0 : i32
    return %arg0, %c0_i32, %c0_i32_0 : i32, i32, i32
  }
  func.func @transform_3(%arg0: i32, %arg1: i32) -> (i32, i32) {
    %c0_i32 = arith.constant 0 : i32
    %c0_i32_0 = arith.constant 0 : i32
    %c0_i32_1 = arith.constant 0 : i32
    return %c0_i32, %c0_i32_0 : i32, i32
  }
  func.func @transform_4(%arg0: i32, %arg1: i32) -> (i32, i32) {
    %c0_i32 = arith.constant 0 : i32
    %c0_i32_0 = arith.constant 0 : i32
    %c0_i32_1 = arith.constant 0 : i32
    return %c0_i32, %c0_i32_0 : i32, i32
  }
  func.func @transform_5(%arg0: i32, %arg1: i32) -> (i32, i32, i32) {
    %c0_i32 = arith.constant 0 : i32
    %c0_i32_0 = arith.constant 0 : i32
    return %arg0, %arg1, %c0_i32 : i32, i32, i32
  }
}

</mosaic_0001>

<bundles_post_ra>
// kernel: tpu_custom_call.1
= control target key start
LH: loop header
LB: loop body
LE: loop exit
PB: predicated region body
PF: predicated region fallthrough
CT: control target
= control target key end

     0   :  { %s1112_s0 = inlined_call_operand.hbm [shape: f32[2,8,32], index: 0, kind: input, shape index: {}]   ;;  %s1113_s1 = inlined_call_operand.hbm [shape: f32[2,1,32], index: 1, kind: input, shape index: {}]   ;;  %s1114_s2 = inlined_call_operand.hbm [shape: f32[2,1,32], index: 2, kind: input, shape index: {}]   ;;  %s1115_s3 = inlined_call_operand.hbm [shape: bf16[32,128], index: 3, kind: input, shape index: {}]   ;;  %s1116_s4 = inlined_call_operand.vmem [shape: f32[1,128], index: 4, kind: input, shape index: {}]   ;;  %s1117_s5 = inlined_call_operand.hbm [shape: f32[2,8,128], index: 5, kind: output, shape index: {}]  }
   0x1   :  { %1126 = sst [smem:[#allocation22_spill]] %s1113_s1 }
   0x2   :  { %1127 = sst [smem:[#allocation23_spill]] %s1115_s3 }
   0x3   :  { %1128 = sst [smem:[#allocation24_spill]] %s1116_s4 }
   0x4   :  { %10 = vsyncpa [#allocation3], 0 }
   0x5   :  { %12 = vsyncpa [#allocation3 + $0x1], 0 }
   0x6   :  { %13 = vsyncpa [#allocation6], 0 }
   0x7   :  { %15 = vsyncpa [#allocation6 + $0x1], 0 }
   0x8   :  { %16 = vsyncpa [#allocation9], 0 }
   0x9   :  { %17 = vsyncpa [#allocation4], 0 }
   0xa   :  { %19 = vsyncpa [#allocation4 + $0x1], 0  ;;  %s921_s18 = smov 0   ;;  %s923_s19 = smov 0  }
   0xb   :  { %s925_s20 = smov 0   ;;  %s927_s21 = smov 0  }
   0xc   :  { %s929_s22 = smov 0   ;;  %s931_s23 = smov 0  }
   0xd LB: > { %1129 = sst [smem:[#allocation15_spill]] %s866_s18  ;;  %s952_s24 = sadd.s32 4294967295, %s886_s23   ;;  %s886_s23 = sphi %s931_s23, %s25_s23   ;;  %s882_s22 = sphi %s929_s22, %s1154_s22   ;;  %s878_s21 = sphi %s927_s21, %s1153_s21   ;;  %s874_s20 = sphi %s925_s20, %s1149_s20   ;;  %s870_s19 = sphi %s923_s19, %s1152_s19   ;;  %s866_s18 = sphi %s921_s18, %s1151_s18  }
   0xe   : > { %1130 = sst [smem:[#allocation16_spill]] %s874_s20  ;;  %s562_s25 = sadd.s32 4294967294, %s886_s23  }
   0xf   : > { %1131 = sst [smem:[#allocation17_spill]] %s886_s23  ;;  %s37_s26 = sadd.s32 1, %s882_s22 }
  0x10   : > { %s46_s27 = sadd.s32 1, %s874_s20  ;;  %p39_p0 = scmp.ge.s32.totalorder %s37_s26, 2 }
  0x11   : > { %p53_p1 = scmp.ne.s32.totalorder %s874_s20, %s870_s19  ;;  %p54_p2 = scmp.eq.s32.totalorder %s886_s23, 0 }
  0x12   : > { %p59_p3 = scmp.ne.s32.totalorder %s870_s19, %s866_s18  ;;  %s1156_s26 = smov (%p39_p0, %s37_s26), 0 }
  0x13   : > { %1132 = sst [smem:[#allocation18_spill]] %s1156_s26  ;;  %p55_p4 = por %p54_p2, %p53_p1 }
  0x14   : > { %p179_p5 = scmp.eq.s32.totalorder %s952_s24, 1  ;;  %s41_s28 = ssub.s32 %s882_s22, %s1156_s26 }
  0x15   : > { %p185_p6 = scmp.eq.s32.totalorder %s562_s25, 1  ;;  %p44_p7 = scmp.eq.s32.totalorder %s41_s28, 0 }
  0x16   : > { %p967_p8 = por %p179_p5, %p53_p1  ;;  %p565_p10 = scmp.ge.s32.totalorder %s886_s23, 2 }
  0x17   : > { %p974_p9 = por %p185_p6, %p59_p3  ;;  %p618_p11 = scmp.lt.s32.totalorder %s886_s23, 2 }
  0x18   : > { %s1133_s29 = scalar_select %p967_p8, 1, 0 }
  0x19   : > { %s1135_s30 = scalar_select %p974_p9, 1, 0 }
  0x1a   : > { %1134 = sst [smem:[#allocation19_spill]] %s1133_s29  ;;  %s984_s7 = sand.u32 1, %s874_s20  }
  0x1b   : > { %1136 = sst [smem:[#allocation20_spill]] %s1135_s30  ;;  %s242_s8 = sand.u32 1, %s886_s23  }
  0x1c   : > { %s979_s6 = scalar_select %p44_p7, %s874_s20, %s46_s27  }
  0x1d   : > { %p987_p12 = pnand %p618_p11, %p55_p4  ;;  %s1139_s1 = sld [smem:[#allocation22_spill]] }
  0x1e   : > { %1137 = sst [smem:[#allocation21_spill]] %s979_s6  ;;  %s245_s14 = scalar_lea.vmem [#allocation5], %s984_s7 }
  0x1f   : > { %s252_s15 = sshll.u32 %s245_s14, 4  ;;  %s996_s16 = scalar_lea.sflag [#allocation6], %s242_s8  ;;  %s253_s15 = int_to_ptr.vmem [resolvable:$true] %s252_s15 }
  0x20   : > { %p60_p13 = scmp.eq.s32.totalorder %s952_s24, 0  ;;  %p563_p0 = scmp.ge.s32.totalorder %s886_s23, 1 }
  0x21   : > { %p192_p1 = scmp.lt.s32.totalorder %s886_s23, 3  ;;  %s1141_s3 = sld [smem:[#allocation23_spill]] }
  0x22   : > { %p1009_p2 = por %p60_p13, %p59_p3  ;;  %s888_s8 = smov [#allocation8]  }
  0x23   : > { %s248_s12 = scalar_lea.hbm %s1139_s1, %s882_s22  ;;  %p1016_p4 = pnand %p563_p0, %p192_p1 }
  0x24   : > { %s250_s13 = sshll.u32 %s248_s12, 4  ;;  %s205_s11 = sshll.u32 %s888_s8, 4  ;;  %s251_s13 = int_to_ptr.hbm [resolvable:$true] %s250_s13  ;;  %s206_s11 = int_to_ptr.vmem [resolvable:$true] %s205_s11 }
  0x25   : > { %609 = dma.hbm_to_vmem [thread:$0]  (!%p987_p12), %s251_s13, 16, %s253_s15, %s996_s16  }
  0x26   : > { %p599_p5 = pneg %p1016_p4  ;;  %s566_s12 = sshll.u32 %s984_s7, 3 }
  0x27   : > { %s203_s28 = sshll.u32 %s1141_s3, 4  ;;  %s567_s13 = sshll.u32 %s882_s22, 3  ;;  %s204_s28 = int_to_ptr.hbm [resolvable:$true] %s203_s28 }
  0x28   : > { %p600_p3 = pnand %p599_p5, %p60_p13  ;;  %s889_s14 = smov 64  }
  0x29   : > { %s890_s15 = smov 4   ;;  %s231_s1 = scalar_lea.hbm %s1112_s0, %s567_s13 }
  0x2a   : > { %602 = dma.hbm_to_vmem [thread:$0]  (!%p600_p3), %s204_s28, 256, %s206_s11, [#allocation9], %s889_s14, %s889_s14, %s890_s15  }
  0x2b   : > { %s226_s3 = scalar_lea.vmem [#allocation2], %s566_s12  ;;  %s233_s6 = sshll.u32 %s231_s1, 4  ;;  %s234_s6 = int_to_ptr.hbm [resolvable:$true] %s233_s6 }
  0x2c   : > { %s235_s26 = sshll.u32 %s226_s3, 4  ;;  %s223_s8 = scalar_lea.sflag [#allocation3], %s984_s7  ;;  %s236_s26 = int_to_ptr.vmem [resolvable:$true] %s235_s26 }
  0x2d   : > { %606 = dma.hbm_to_vmem [thread:$0]  (!%p987_p12), %s234_s6, 128, %s236_s26, %s223_s8  }
  0x2e   : > { %s265_s30 = scalar_lea.hbm %s1114_s2, %s882_s22  ;;  %s262_s18 = scalar_lea.vmem [#allocation7], %s984_s7 }
  0x2f   : > { %s269_s4 = sshll.u32 %s262_s18, 4  ;;  %s267_s29 = sshll.u32 %s265_s30, 4  ;;  %s270_s4 = int_to_ptr.vmem [resolvable:$true] %s269_s4  ;;  %s268_s29 = int_to_ptr.hbm [resolvable:$true] %s267_s29 }
  0x30   : > { %612 = dma.hbm_to_vmem [thread:$0]  (!%p987_p12), %s268_s29, 16, %s270_s4, %s996_s16  }
  0x31   : > { %278 = sbr.rel (%p1016_p4) target bundleno = 352 (0x160), region = 40  ;;  %s1043_s1 = sand.u32 (!%p1016_p4), 1, %s870_s19  }
  0x32   : > { %s569_s3 = sshll.u32 (!%p1016_p4), %s1043_s1, 3  ;;  %s281_s20 = scalar_lea.sflag (!%p1016_p4), [#allocation3], %s1043_s1 }
  0x33   : > { %s284_s23 = scalar_lea.vmem (!%p1016_p4), [#allocation2], %s569_s3 }
  0x36   : > { %849 = dma.done.wait (%p1009_p2), %s281_s20, 128  }
  0x37   : > { %851 = vsyncadd (%p1009_p2), %s281_s20, 4294967168  ;;  %s290_s4 = sand.u32 1, %s952_s24   ;;  %s293_s26 = scalar_lea.vmem [#allocation5], %s1043_s1 }
  0x38   : > { %s291_s18 = scalar_lea.sflag [#allocation6], %s290_s4 }
  0x39   : > { %853 = dma.done.wait (%p1009_p2), %s291_s18, 32  }
  0x3a   : > { %855 = vsyncadd (%p1009_p2), %s291_s18, 4294967264  ;;  %s302_s29 = scalar_lea.vmem [#allocation7], %s1043_s1 }
  0x3b   : > { %857 = dma.done.wait (%p60_p13), [#allocation9], 256  }
  0x3c   : > { %859 = vsyncadd (%p60_p13), [#allocation9], 4294967040  ;;  %vm347_vm0 = vcmask 261120   ;;  %v344_v0 = vld [vmem:[%s284_s23] sm:$0xff]  ;;  %v585_v6 = vld [vmem:[#allocation8] sm:$0xff]  ;;  %s582_s24 = sshll.u32 %s878_s21, 3 }
  0x3d   : > { %v348_v1 = vsel %vm347_vm0, %v344_v0, 0.0  ;;  %v352_v2 = vmul.f32 %v344_v0, %v344_v0  ;;  %v586_v4 = vld [vmem:[#allocation8 + $0x8] sm:$0xff]  ;;  %s431_s9 = scalar_lea.hbm %s1117_s5, %s582_s24  ;;  %s1144_s28 = sld [smem:[#allocation24_spill]] }
  0x3e   : > { %349 = vadd.xlane.f32.xlu0 %v348_v1  ;;  %411 = vmatpush.bf16.msra.mxu0 %v586_v4  ;;  %v346_v16 = vld [vmem:[%s302_s29] sm:$0x1]  ;;  %s342_s10 = scalar_lea.vmem [#allocation10], %s569_s3  ;;  %s435_s12 = sshll.u32 %s431_s9, 4  ;;  %s436_s12 = int_to_ptr.hbm [resolvable:$true] %s435_s12 }
  0x3f   : > { %v353_v3 = vsel %vm347_vm0, %v352_v2, 0.0  ;;  %v372_v18 = vadd.f32 1.0, %v346_v16  ;;  %v672_v25 = vld [vmem:[%s293_s26] ss:$0 sm:$0xff]  ;;  %s433_s11 = sshll.u32 %s342_s10, 4  ;;  %s420_s13 = scalar_lea.sflag [#allocation4], %s1043_s1  ;;  %s434_s11 = int_to_ptr.vmem [resolvable:$true] %s433_s11 }
  0x40   : > { %s810_s21 = sshra.s32 %s436_s12, 4  ;;  %s816_s27 = scalar_lea.hbm %s1117_s5, 16  ;;  %s811_s21 = int_to_ptr.hbm [resolvable:$true] %s810_s21 }
  0x41   : > { %v374_v22 = vperm.slane %v372_v18, 0  ;;  %s812_s14 = scalar_lea.hbm %s811_s21, 8  ;;  %p817_p12 = scmp.lt.s32.totalorder %s811_s21, %s1117_s5 }
  0x42   : > { %412 = vmatpush.bf16.msra.mxu0 %v585_v6  ;;  %p813_p6 = scmp.ne.s32.totalorder %s811_s21, %s812_s14  ;;  %p818_p13 = scmp.lt.s32.totalorder %s816_s27, %s812_s14 }
  0x43   : > { %v673_v29 = vld [vmem:[%s1144_s28] ss:$0 sm:$0xff] }
  0x44   : > { %p814_p7 = pnand %p813_p6, %p967_p8  ;;  %p819_p0 = por %p818_p13, %p817_p12 }
  0x46   : > { %354 = vadd.xlane.f32.xlu0 %v353_v3  ;;  %p815_p11 = pneg %p814_p7 }
  0x48   : > { %p820_p1 = pnand %p819_p0, %p815_p11 }
  0xb1   : > { %v350_v5 = vpop.xlane.xlu0 %349 }
  0xb2   : > { %v351_v7 = vmul.f32 0.03125, %v350_v5 }
  0xb4   : > { %v357_v9 = vmul.f32 %v351_v7, %v351_v7  ;;  %v359_v21 = vsub.f32 %v344_v0, %v351_v7 }
  0xb9   : > { %v355_v8 = vpop.xlane.xlu0 %354 }
  0xba   : > { %v356_v10 = vmul.f32 0.03125, %v355_v8 }
  0xbc   : > { %v358_v11 = vsub.f32 %v356_v10, %v357_v9 }
  0xbe   : > { %v360_v12 = vadd.f32 1e-06, %v358_v11 }
  0xc0   : > { %674 = vrsqrt.f32 %v360_v12  ;;  %vm367_vm2 = vweird.f32 %v360_v12 }
  0xc6   : > { %v675_v13 = vpop.eup %674 }
  0xc7   : > { %v362_v14 = vmul.f32 %v675_v13, %v360_v12  ;;  %vm368_vm1 = vweird.f32 %v675_v13 }
  0xc8   : > { %vm369_vm3 = vmor %vm367_vm2, %vm368_vm1 }
  0xc9   : > { %v363_v15 = vmul.f32 %v675_v13, %v362_v14 }
  0xcb   : > { %v364_v17 = vmul.f32 0.5, %v363_v15 }
  0xcd   : > { %v365_v19 = vsub.f32 1.5, %v364_v17 }
  0xcf   : > { %v366_v20 = vmul.f32 %v675_v13, %v365_v19 }
  0xd1   : > { %v370_v23 = vsel %vm369_vm3, %v675_v13, %v366_v20 }
  0xd2   : > { %v371_v24 = vmul.f32 %v370_v23, %v359_v21 }
  0xd4   : > { %v376_v26 = vmul.f32 %v374_v22, %v371_v24 }
  0xd6   : > { %v380_v27 = vadd.f32 %v672_v25, %v376_v26 }
  0xd8   : > { %v381_v28 = vpack.c.bf16 %v380_v27, %v380_v27 }
  0xda   : > { %580 = vmatmul.msk.bf16.vlgmr.msra.gmra.mxu0 %vm347_vm0, %v381_v28 }
 0x157   : > { %v414_v30 = vpop.f32.mrf.mxu0 }
 0x158   : > { %v415_v31 = vadd.f32 %v673_v29, %v414_v30 }
 0x15a   : > { %418 = vst [vmem:[%s342_s10] sm:$0xff] %v415_v31 }
 0x15b   : > { %823 = shalt.err (!%p820_p1)
}
 0x15c   : > { %597 = dma.vmem_to_hbm [thread:$0]  (%p967_p8), %s434_s11, 128, %s436_s12, %s420_s13  }
 0x15f   : > { %v416_v32 = vpop.f32.mrf.mxu0 }
 0x160 PF: > { %s1145_s1 = sld [smem:[#allocation15_spill]]  ;;  %p614_p2 = pnand %p565_p10, %p974_p9 }
 0x161   : > { %s1147_s23 = sld [smem:[#allocation17_spill]] }
 0x162   : > { %p615_p4 = pneg %p614_p2 }
 0x166   : > { %s447_s4 = sand.u32 1, %s1145_s1  }
 0x167   : > { %s448_s18 = scalar_lea.sflag [#allocation4], %s447_s4 }
 0x168   : > { %861 = dma.done.wait (%p615_p4), %s448_s18, 128  }
 0x169   : > { %863 = vsyncadd (%p615_p4), %s448_s18, 4294967168  ;;  %s25_s23 = sadd.s32 1, %s1147_s23   ;;  %s1148_s26 = sld [smem:[#allocation16_spill]] }
 0x16a   : > { %p22_p5 = scmp.ge.s32.totalorder %s25_s23, 4   ;;  %s1149_s20 = sld [smem:[#allocation21_spill]] }
 0x16b   : > { %s1150_s29 = sld [smem:[#allocation18_spill]]  ;;  %s1151_s18 = smov %s870_s19 }
 0x16c   : > { %s1153_s21 = smov %s882_s22 }
 0x16d   :  { %24 = sbr.rel (!%p22_p5) target bundleno = 13 (0xd), region = 113 }
 0x16f   : > { %s1152_s19 = smov %s1148_s26 }
 0x171   : > { %s1154_s22 = smov %s1150_s29 }
 0x172   :  { %454 = vsyncpa [#allocation3], 1 }
 0x173   :  { %456 = vsyncpa [#allocation3 + $0x1], 1 }
 0x174   :  { %457 = vsyncpa [#allocation6], 1 }
 0x175   :  { %459 = vsyncpa [#allocation6 + $0x1], 1 }
 0x176   :  { %460 = vsyncpa [#allocation9], 1 }
 0x177   :  { %461 = vsyncpa [#allocation4], 1 }
 0x178   :  { %463 = vsyncpa [#allocation4 + $0x1], 1 }

</bundles_post_ra>
